<compile_context>
chip_gen: v7x
topology: tpu7x:2x2x1
jax: 0.10.0
libtpu: 0.0.40
codegen_flags: <defaults>
</compile_context>

<pallas_src>
import functools

import jax
import jax.numpy as jnp
from jax import lax
from jax.experimental import pallas as pl
from jax.experimental.pallas import tpu as pltpu

LANES = 128            # vreg lane width (last dim)
SUBLANES = 8           # f32 vreg sublane width
MAX_TILE_ROWS = 4096   # (4096,128) f32 block = 2 MiB; 2 inputs x 2 bufs = 8 MiB VMEM
CHUNK_ROWS = 512       # in-kernel working-set bound: (512,128) f32 temps ~256 KiB each
VMEM_LIMIT_BYTES = 32 * 1024 * 1024   # explicit; safe on v5e/v6e (128 MiB) and v7x (64 MiB)


def _round_up(v, m):
    return ((v + m - 1) // m) * m


def _sublane_multiple(dtype):
    # Native second-minor tile: 8 rows for 32-bit, 16 for 16-bit, 32 for 8-bit dtypes.
    return SUBLANES * max(1, 4 // jnp.dtype(dtype).itemsize)


def _int_pow(u, n):
    """u**n for a small static non-negative integer n via repeated multiply (VPU only)."""
    if n == 0:
        return jnp.ones_like(u)
    r = u
    for _ in range(n - 1):
        r = r * u
    return r


def _focal_elementwise(x, t, alpha, gamma):
    """Numerically stable BCEWithLogits + focal modulation; f32 in, f32 out."""
    bce = jnp.maximum(x, 0.0) - x * t + jnp.log1p(jnp.exp(-jnp.abs(x)))
    pt = jnp.exp(-bce)
    u = 1.0 - pt
    g = float(gamma)
    if g.is_integer() and 0.0 <= g <= 16.0:
        mod = _int_pow(u, int(g))          # default gamma=2: pure VPU multiplies
    else:
        mod = u ** g
    return alpha * mod * bce


def _focal_loss_kernel(x_ref, t_ref, o_ref, *, alpha, gamma, tile_rows,
                       chunk_rows, n_blocks, rem_rows):
    """One (tile_rows,128) block -> one (8,128) partial-sum slab."""
    n_chunks = tile_rows // chunk_rows

    def chunk_sum(xc, tc, row_limit=None):
        fl = _focal_elementwise(xc.astype(jnp.float32), tc.astype(jnp.float32),
                                alpha, gamma)
        if row_limit is not None:
            # Static, small row threshold; where() is a select so NaN/Inf in
            # stale (never-DMA'd) rows cannot leak through.
            rowid = lax.broadcasted_iota(jnp.int32, fl.shape, 0)
            fl = jnp.where(rowid < row_limit, fl, 0.0)
        r = fl.shape[0]
        # (r,128) -> (8,128) with VPU adds only (groups whole native (8,128) tiles).
        return fl.reshape(r // SUBLANES, SUBLANES, LANES).sum(axis=0)

    def full_block():
        if n_chunks == 1:
            return chunk_sum(x_ref[...], t_ref[...])

        def body(c, acc):
            start = pl.multiple_of(c * chunk_rows, chunk_rows)
            return acc + chunk_sum(x_ref[pl.ds(start, chunk_rows), :],
                                   t_ref[pl.ds(start, chunk_rows), :])

        return lax.fori_loop(0, n_chunks, body,
                             jnp.zeros((SUBLANES, LANES), jnp.float32),
                             unroll=True)

    def tail_block():
        # Only the last block is partial; rem_rows is static -> fully specialised.
        acc = jnp.zeros((SUBLANES, LANES), jnp.float32)
        n_full = rem_rows // chunk_rows
        part = rem_rows - n_full * chunk_rows
        if n_full == 1:
            acc = acc + chunk_sum(x_ref[pl.ds(0, chunk_rows), :],
                                  t_ref[pl.ds(0, chunk_rows), :])
        elif n_full > 1:
            def body(c, a):
                start = pl.multiple_of(c * chunk_rows, chunk_rows)
                return a + chunk_sum(x_ref[pl.ds(start, chunk_rows), :],
                                     t_ref[pl.ds(start, chunk_rows), :])
            acc = lax.fori_loop(0, n_full, body, acc, unroll=True)
        if part > 0:
            s = n_full * chunk_rows        # static start
            acc = acc + chunk_sum(x_ref[pl.ds(s, chunk_rows), :],
                                  t_ref[pl.ds(s, chunk_rows), :],
                                  row_limit=part)
        return acc

    has_tail = rem_rows != tile_rows
    if not has_tail:
        o_ref[...] = full_block()[None]
    elif n_blocks == 1:
        o_ref[...] = tail_block()[None]
    else:
        i = pl.program_id(0)

        @pl.when(i != n_blocks - 1)
        def _():
            o_ref[...] = full_block()[None]

        @pl.when(i == n_blocks - 1)
        def _():
            o_ref[...] = tail_block()[None]


def binary_focal_loss(inputs, targets, *, alpha=1.0, gamma=2.0, size_average=True):
    """Pallas TPU implementation of BinaryFocalLoss.forward (logits + BCEWithLogits)."""
    assert inputs.shape == targets.shape
    n = int(inputs.size)
    assert n > 0

    x = inputs.reshape(-1)
    t = targets.reshape(-1)

    n_main = (n // LANES) * LANES     # lane-aligned prefix handled by the kernel
    n_tail = n - n_main               # < 128 elements, handled by plain jnp

    total = jnp.float32(0.0)

    if n_main > 0:
        if n_tail:
            xm, tm = x[:n_main], t[:n_main]
        else:
            xm, tm = x, t             # lane-aligned: no pad, no slice, free reshape
        rows = n_main // LANES
        x2 = xm.reshape(rows, LANES)
        t2 = tm.reshape(rows, LANES)

        sub = max(_sublane_multiple(x2.dtype), _sublane_multiple(t2.dtype))
        rows_r = _round_up(rows, sub)
        if rows_r >= MAX_TILE_ROWS:
            tile_rows, chunk_rows = MAX_TILE_ROWS, CHUNK_ROWS
        elif rows_r > CHUNK_ROWS:
            tile_rows, chunk_rows = _round_up(rows_r, CHUNK_ROWS), CHUNK_ROWS
        else:
            tile_rows, chunk_rows = rows_r, rows_r
        n_blocks = pl.cdiv(rows, tile_rows)
        rem_rows = rows - (n_blocks - 1) * tile_rows   # rows in last (maybe partial) block

        kernel = functools.partial(
            _focal_loss_kernel,
            alpha=float(alpha), gamma=float(gamma),
            tile_rows=tile_rows, chunk_rows=chunk_rows,
            n_blocks=n_blocks, rem_rows=rem_rows)

        cost = pl.CostEstimate(
            flops=15 * n_main,
            transcendentals=3 * n_main,
            bytes_accessed=n_main * (x2.dtype.itemsize + t2.dtype.itemsize)
                           + n_blocks * SUBLANES * LANES * 4)

        partials = pl.pallas_call(
            kernel,
            out_shape=jax.ShapeDtypeStruct((n_blocks, SUBLANES, LANES), jnp.float32),
            grid=(n_blocks,),
            in_specs=[pl.BlockSpec((tile_rows, LANES), lambda i: (i, 0)),
                      pl.BlockSpec((tile_rows, LANES), lambda i: (i, 0))],
            out_specs=pl.BlockSpec((1, SUBLANES, LANES), lambda i: (i, 0, 0)),
            compiler_params=pltpu.CompilerParams(
                dimension_semantics=("parallel",),
                vmem_limit_bytes=VMEM_LIMIT_BYTES),
            cost_estimate=cost,
        )(x2, t2)
        total = total + jnp.sum(partials)

    if n_tail:
        xt = x[n_main:].astype(jnp.float32)
        tt = t[n_main:].astype(jnp.float32)
        total = total + jnp.sum(_focal_elementwise(xt, tt, float(alpha), float(gamma)))

    if size_average:
        return total / jnp.float32(n)
    return total


def _reference(inputs, targets, alpha=1.0, gamma=2.0, size_average=True):
    x = inputs.astype(jnp.float32)
    t = targets.astype(jnp.float32)
    bce = jnp.maximum(x, 0.0) - x * t + jnp.log1p(jnp.exp(-jnp.abs(x)))
    pt = jnp.exp(-bce)
    fl = alpha * (1.0 - pt) ** gamma * bce
    return jnp.mean(fl) if size_average else jnp.sum(fl)


if __name__ == "__main__":
    key = jax.random.PRNGKey(0)
    k1, k2, k3, k4, k5, k6 = jax.random.split(key, 6)

    # 1) Small NCHW logits + binary targets, lane-aligned size, mean reduction
    #    (default module config).  Single full block, no masking.
    x = jax.random.normal(k1, (2, 4, 16, 16), dtype=jnp.float32) * 2.0
    targ = (jax.random.uniform(k2, (2, 4, 16, 16)) > 0.5).astype(jnp.float32)
    loss = jax.block_until_ready(
        binary_focal_loss(x, targ, alpha=1.0, gamma=2.0, size_average=True))
    ref = jax.block_until_ready(_reference(x, targ, 1.0, 2.0, True))
    assert jnp.isfinite(loss)
    assert jnp.allclose(loss, ref, rtol=1e-5, atol=1e-6), (loss, ref)

    # 2) Ragged element count (315): <128-element lane tail computed in the
    #    wrapper, row-masked partial block in the kernel, sum reduction.
    xr = jax.random.normal(k3, (3, 5, 7, 3), dtype=jnp.float32) * 2.0
    tr = (jax.random.uniform(k4, (3, 5, 7, 3)) > 0.5).astype(jnp.float32)
    loss_r = jax.block_until_ready(
        binary_focal_loss(xr, tr, alpha=0.75, gamma=2.0, size_average=False))
    ref_r = jax.block_until_ready(_reference(xr, tr, 0.75, 2.0, False))
    assert jnp.isfinite(loss_r)
    assert jnp.allclose(loss_r, ref_r, rtol=1e-5, atol=1e-6), (loss_r, ref_r)

    # 3) Larger feature map: exercises multi-block grid, the in-kernel chunked
    #    fori_loop accumulation, and the pl.when full/tail block split.
    xm = jax.random.normal(k5, (8, 8, 96, 128), dtype=jnp.float32) * 2.0
    tm = (jax.random.uniform(k6, (8, 8, 96, 128)) > 0.5).astype(jnp.float32)
    loss_m = jax.block_until_ready(binary_focal_loss(xm, tm))
    ref_m = jax.block_until_ready(_reference(xm, tm, 1.0, 2.0, True))
    assert jnp.isfinite(loss_m)
    assert jnp.allclose(loss_m, ref_m, rtol=1e-4, atol=1e-6), (loss_m, ref_m)

    print("KERNEL_OK")
</pallas_src>

<mosaic_0001>
module attributes {stable_mosaic.version = 11 : i64} {
  func.func @_focal_loss_kernel(%arg0: i32, %arg1: memref<16x128xf32, #tpu.memory_space<vmem>>, %arg2: memref<16x128xf32, #tpu.memory_space<vmem>>, %arg3: memref<1x8x128xf32, #tpu.memory_space<vmem>>) attributes {dimension_semantics = [#tpu.dimension_semantics<parallel>], iteration_bounds = array<i64: 1>, scalar_prefetch = 0 : i64, scratch_operands = 0 : i64, tpu.core_type = #tpu.core_type<tc>, window_params = [{transform_indices = @transform_0, window_bounds = array<i64: 16, 128>}, {transform_indices = @transform_1, window_bounds = array<i64: 16, 128>}, {transform_indices = @transform_2, window_bounds = array<i64: 1, 8, 128>}]} {
    %c0 = arith.constant 0 : index
    %c0_0 = arith.constant 0 : index
    %0 = vector.load %arg1[%c0, %c0_0] : memref<16x128xf32, #tpu.memory_space<vmem>>, vector<16x128xf32>
    %c0_1 = arith.constant 0 : index
    %c0_2 = arith.constant 0 : index
    %1 = vector.load %arg2[%c0_1, %c0_2] : memref<16x128xf32, #tpu.memory_space<vmem>>, vector<16x128xf32>
    %cst = arith.constant 0.000000e+00 : f32
    %2 = vector.broadcast %cst : f32 to vector<16x128xf32>
    %3 = arith.maximumf %0, %2 : vector<16x128xf32>
    %4 = arith.mulf %0, %1 : vector<16x128xf32>
    %5 = arith.subf %3, %4 : vector<16x128xf32>
    %6 = math.absf %0 : vector<16x128xf32>
    %cst_3 = arith.constant 0.000000e+00 : f32
    %7 = vector.broadcast %cst_3 : f32 to vector<16x128xf32>
    %8 = arith.subf %7, %6 : vector<16x128xf32>
    %9 = math.exp %8 : vector<16x128xf32>
    %10 = math.log1p %9 : vector<16x128xf32>
    %11 = arith.addf %5, %10 : vector<16x128xf32>
    %cst_4 = arith.constant 0.000000e+00 : f32
    %12 = vector.broadcast %cst_4 : f32 to vector<16x128xf32>
    %13 = arith.subf %12, %11 : vector<16x128xf32>
    %14 = math.exp %13 : vector<16x128xf32>
    %cst_5 = arith.constant 1.000000e+00 : f32
    %15 = vector.broadcast %cst_5 : f32 to vector<16x128xf32>
    %16 = arith.subf %15, %14 : vector<16x128xf32>
    %17 = arith.mulf %16, %16 : vector<16x128xf32>
    %cst_6 = arith.constant 1.000000e+00 : f32
    %18 = vector.broadcast %cst_6 : f32 to vector<16x128xf32>
    %19 = arith.mulf %18, %17 : vector<16x128xf32>
    %20 = arith.mulf %19, %11 : vector<16x128xf32>
    %21 = vector.shape_cast %20 : vector<16x128xf32> to vector<2x8x128xf32>
    %cst_7 = arith.constant dense<0.000000e+00> : vector<8x128xf32>
    %22 = vector.multi_reduction <add>, %21, %cst_7 [0] : vector<2x8x128xf32> to vector<8x128xf32>
    %23 = vector.shape_cast %22 : vector<8x128xf32> to vector<1x8x128xf32>
    %c0_8 = arith.constant 0 : index
    %c0_9 = arith.constant 0 : index
    %c0_10 = arith.constant 0 : index
    %24 = vector.load %arg3[%c0_8, %c0_9, %c0_10] : memref<1x8x128xf32, #tpu.memory_space<vmem>>, vector<1x8x128xf32>
    tpu.vector_store %arg3[%c0_8, %c0_9, %c0_10], %23 {strides = array<i32>} : memref<1x8x128xf32, #tpu.memory_space<vmem>>, vector<1x8x128xf32>,
    return
  }
  func.func @transform_0(%arg0: i32) -> (i32, i32) {
    %c0_i32 = arith.constant 0 : i32
    %c0_i32_0 = arith.constant 0 : i32
    return %arg0, %c0_i32 : i32, i32
  }
  func.func @transform_1(%arg0: i32) -> (i32, i32) {
    %c0_i32 = arith.constant 0 : i32
    %c0_i32_0 = arith.constant 0 : i32
    return %arg0, %c0_i32 : i32, i32
  }
  func.func @transform_2(%arg0: i32) -> (i32, i32, i32) {
    %c0_i32 = arith.constant 0 : i32
    %c0_i32_0 = arith.constant 0 : i32
    %c0_i32_1 = arith.constant 0 : i32
    return %arg0, %c0_i32, %c0_i32_0 : i32, i32, i32
  }
}

</mosaic_0001>

<bundles_post_ra>
// kernel: tpu_custom_call.1
= control target key start
LH: loop header
LB: loop body
LE: loop exit
PB: predicated region body
PF: predicated region fallthrough
CT: control target
= control target key end

     0   :  { %7 = vsyncpa [#allocation3], 0  ;;  %s253_s0 = inlined_call_operand.hbm [shape: f32[16,128], index: 0, kind: input, shape index: {}]   ;;  %s254_s1 = inlined_call_operand.hbm [shape: f32[16,128], index: 1, kind: input, shape index: {}]   ;;  %s255_s2 = inlined_call_operand.hbm [shape: f32[1,8,128], index: 2, kind: output, shape index: {}]  }
   0x1   :  { %8 = vsyncpa [#allocation6], 0 }
   0x2   :  { %9 = vsyncpa [#allocation4], 0  ;;  %s197_s9 = smov [#allocation2]   ;;  %s125_s13 = scalar_lea.hbm %s253_s0, 256 }
   0x3   :  { %s15_s10 = sshll.u32 %s197_s9, 4  ;;  %p126_p0 = scmp.ne.s32.totalorder %s253_s0, %s125_s13  ;;  %s16_s10 = int_to_ptr.vmem [resolvable:$true] %s15_s10 }
   0x4   :  { %p129_p1 = scmp.lt.u32.totalorder %s125_s13, %s253_s0 }
   0x6   :  { %p131_p2 = pnand %p129_p1, %p126_p0 }
   0x8   :  { %134 = shalt.err (!%p131_p2)
}
   0x9   :  { %s135_s18 = scalar_lea.vmem %s16_s10, 256  ;;  %p140_p4 = scmp.lt.s32.totalorder %s16_s10, %s16_s10 }
   0xa   :  { %p136_p3 = scmp.ne.s32.totalorder %s16_s10, %s135_s18  ;;  %p141_p5 = scmp.lt.s32.totalorder %s135_s18, %s135_s18 }
   0xc   :  { %p142_p6 = por %p141_p5, %p140_p4 }
   0xe   :  { %p143_p7 = pnand %p142_p6, %p136_p3 }
  0x10   :  { %146 = shalt.err (!%p143_p7)
}
  0x11   :  { %s198_s19 = smov 128   ;;  %s199_s20 = smov 8  }
  0x12   :  { %21 = dma.hbm_to_vmem [thread:$0]  %s253_s0, 256, %s16_s10, [#allocation3], %s198_s19, %s198_s19, %s199_s20  }
  0x13   :  { %s200_s23 = smov [#allocation5]   ;;  %s147_s27 = scalar_lea.hbm %s254_s1, 256 }
  0x14   :  { %s27_s24 = sshll.u32 %s200_s23, 4  ;;  %p148_p8 = scmp.ne.s32.totalorder %s254_s1, %s147_s27  ;;  %s28_s24 = int_to_ptr.vmem [resolvable:$true] %s27_s24 }
  0x15   :  { %p151_p9 = scmp.lt.u32.totalorder %s147_s27, %s254_s1 }
  0x17   :  { %p153_p10 = pnand %p151_p9, %p148_p8 }
  0x19   :  { %156 = shalt.err (!%p153_p10)
}
  0x1a   :  { %s157_s4 = scalar_lea.vmem %s28_s24, 256  ;;  %p162_p12 = scmp.lt.s32.totalorder %s28_s24, %s28_s24 }
  0x1b   :  { %p158_p11 = scmp.ne.s32.totalorder %s28_s24, %s157_s4  ;;  %p163_p13 = scmp.lt.s32.totalorder %s157_s4, %s157_s4 }
  0x1d   :  { %p164_p0 = por %p163_p13, %p162_p12 }
  0x1f   :  { %p165_p1 = pnand %p164_p0, %p158_p11 }
  0x21   :  { %168 = shalt.err (!%p165_p1)
}
  0x22   :  { %33 = dma.hbm_to_vmem [thread:$0]  %s254_s1, 256, %s28_s24, [#allocation6], %s198_s19, %s198_s19, %s199_s20  }
  0x23   :  { %191 = dma.done.wait [#allocation3], 256  }
  0x24   :  { %192 = vsyncadd [#allocation3], 4294967040 }
  0x25   :  { %193 = dma.done.wait [#allocation6], 256  }
  0x26   :  { %194 = vsyncadd [#allocation6], 4294967040  ;;  %v40_v0 = vld [vmem:[#allocation2] sm:$0xff]  ;;  %v41_v1 = vld [vmem:[#allocation2 + $0x8] sm:$0xff]  ;;  %s201_s1 = smov [#allocation7]  }
  0x27   :  { %v50_v2 = vand.u32 2147483647, %v40_v0  ;;  %v51_v3 = vand.u32 2147483647, %v41_v1  ;;  %v42_v14 = vld [vmem:[#allocation5] sm:$0xff]  ;;  %v43_v15 = vld [vmem:[#allocation5 + $0x8] sm:$0xff] }
  0x28   :  { %v44_v17 = vmax.f32 %v40_v0, 0.0  ;;  %v46_v18 = vmul.f32 %v42_v14, %v40_v0  ;;  %v45_v21 = vmax.f32 %v41_v1, 0.0  ;;  %v47_v22 = vmul.f32 %v43_v15, %v41_v1  ;;  %s98_s6 = sshll.u32 %s201_s1, 4  ;;  %s99_s6 = int_to_ptr.vmem [resolvable:$true] %s98_s6 }
  0x29   :  { %v52_v4 = vsub.f32 0.0, %v50_v2  ;;  %v53_v5 = vsub.f32 0.0, %v51_v3  ;;  %s169_s7 = scalar_lea.vmem %s99_s6, 128  ;;  %p174_p3 = scmp.lt.s32.totalorder %s99_s6, %s99_s6 }
  0x2a   :  { %v48_v26 = vsub.f32 %v44_v17, %v46_v18  ;;  %v49_v29 = vsub.f32 %v45_v21, %v47_v22  ;;  %p170_p2 = scmp.ne.s32.totalorder %s99_s6, %s169_s7  ;;  %p175_p4 = scmp.lt.s32.totalorder %s169_s7, %s169_s7 }
  0x2b   :  { %v54_v6 = vmul.f32 1.442695, %v52_v4  ;;  %v56_v7 = vmul.f32 1.442695, %v53_v5 }
  0x2c   :  { %p176_p5 = por %p175_p4, %p174_p3 }
  0x2d   :  { %113 = vpow2.f32 %v54_v6 }
  0x2e   :  { %115 = vpow2.f32 %v56_v7  ;;  %p177_p6 = pnand %p176_p5, %p170_p2 }
  0x37   :  { %v114_v8 = vpop.eup %113 }
  0x38   :  { %v116_v9 = vpop.eup %115  ;;  %v58_v10 = vadd.f32 1.0, %v114_v8  ;;  %v61_v12 = vmul.f32 -0.5, %v114_v8  ;;  %v64_v19 = vand.u32 2147483647, %v114_v8 }
  0x39   :  { %v67_v11 = vadd.f32 1.0, %v116_v9  ;;  %v70_v13 = vmul.f32 -0.5, %v116_v9  ;;  %v73_v23 = vand.u32 2147483647, %v116_v9 }
  0x3a   :  { %117 = vlog2.f32 %v58_v10  ;;  %v62_v16 = vadd.f32 1.0, %v61_v12  ;;  %vm65_vm0 = vcmp.lt.f32.partialorder %v64_v19, 0.0004427343 }
  0x3b   :  { %119 = vlog2.f32 %v67_v11  ;;  %v71_v20 = vadd.f32 1.0, %v70_v13  ;;  %vm74_vm1 = vcmp.lt.f32.partialorder %v73_v23, 0.0004427343 }
  0x3c   :  { %v63_v24 = vmul.f32 %v114_v8, %v62_v16 }
  0x3d   :  { %v72_v27 = vmul.f32 %v116_v9, %v71_v20 }
  0x44   :  { %v118_v25 = vpop.eup %117 }
  0x45   :  { %v120_v28 = vpop.eup %119  ;;  %v60_v30 = vmul.f32 0.6931472, %v118_v25 }
  0x46   :  { %v69_v31 = vmul.f32 0.6931472, %v120_v28 }
  0x47   :  { %v66_v32 = vsel %vm65_vm0, %v63_v24, %v60_v30 }
  0x48   :  { %v75_v33 = vsel %vm74_vm1, %v72_v27, %v69_v31  ;;  %v76_v34 = vadd.f32 %v66_v32, %v48_v26 }
  0x49   :  { %v77_v35 = vadd.f32 %v75_v33, %v49_v29 }
  0x4a   :  { %v78_v36 = vsub.f32 0.0, %v76_v34 }
  0x4b   :  { %v79_v37 = vsub.f32 0.0, %v77_v35 }
  0x4c   :  { %v80_v38 = vmul.f32 1.442695, %v78_v36 }
  0x4d   :  { %v82_v39 = vmul.f32 1.442695, %v79_v37 }
  0x4e   :  { %121 = vpow2.f32 %v80_v38 }
  0x4f   :  { %123 = vpow2.f32 %v82_v39 }
  0x58   :  { %v122_v40 = vpop.eup %121 }
  0x59   :  { %v124_v41 = vpop.eup %123  ;;  %v84_v42 = vsub.f32 1.0, %v122_v40 }
  0x5a   :  { %v85_v43 = vsub.f32 1.0, %v124_v41 }
  0x5b   :  { %v86_v44 = vmul.f32 %v84_v42, %v84_v42 }
  0x5c   :  { %v87_v45 = vmul.f32 %v85_v43, %v85_v43 }
  0x5d   :  { %v88_v46 = vmul.f32 %v86_v44, %v76_v34 }
  0x5e   :  { %v89_v47 = vmul.f32 %v87_v45, %v77_v35 }
  0x60   :  { %v90_v48 = vadd.f32 %v89_v47, %v88_v46 }
  0x62   :  { %91 = vst [vmem:[#allocation7] sm:$0xff] %v90_v48 }
  0x63   :  { %180 = shalt.err (!%p177_p6)
}
  0x64   :  { %s181_s10 = scalar_lea.hbm %s255_s2, 128 }
  0x65   :  { %p182_p7 = scmp.ne.s32.totalorder %s255_s2, %s181_s10  ;;  %p185_p8 = scmp.lt.u32.totalorder %s181_s10, %s255_s2 }
  0x67   :  { %p187_p9 = pnand %p185_p8, %p182_p7 }
  0x69   :  { %190 = shalt.err (!%p187_p9)
}
  0x6a   :  { %101 = dma.vmem_to_hbm [thread:$0]  %s99_s6, 128, %s255_s2, [#allocation4]  }
  0x6b   :  { %195 = dma.done.wait [#allocation4], 128  }
  0x6c   :  { %196 = vsyncadd [#allocation4], 4294967168 }
  0x6d   :  { %105 = vsyncpa [#allocation3], 1 }
  0x6e   :  { %106 = vsyncpa [#allocation6], 1 }
  0x6f   :  { %107 = vsyncpa [#allocation4], 1 }

</bundles_post_ra>
